<compile_context>
chip_gen: v7x
topology: tpu7x:2x2x1
jax: 0.10.0
libtpu: 0.0.40
codegen_flags: <defaults>
</compile_context>

<pallas_src>
import jax
import jax.numpy as jnp
import numpy as np
from jax.experimental import pallas as pl
from jax.experimental.pallas import tpu as pltpu


def baseline_kernel(max_len_ref, ol_len_ref, mc_ref, topo_emb_ref, ol_emb_ref,
                    w_ih_ref, w_hh_ref, b_rnn_ref,
                    v_topo_ref, v_mc_ref, v_ol_ref, b_eff_ref,
                    out_ref, xproj_ref, h_ref):
    B = mc_ref.shape[0]
    H = w_hh_ref.shape[1]
    TB = ol_emb_ref.shape[0]
    T = TB // B

    max_len = max_len_ref[0]                              # int32 scalar (SMEM)

    # ---- batched input projection, off the recurrent chain ----------------
    # xproj[t*B + b, :] = ol_emb[t, b, :] @ W_ih + b_rnn   (bias folded here)
    xproj_ref[...] = (
        jnp.dot(ol_emb_ref[...], w_ih_ref[...],
                preferred_element_type=jnp.float32)
        + b_rnn_ref[...])

    # ---- recurrence: h_{t+1} = tanh(xproj[t] + h_t @ W_hh) -----------------
    # Fully unrolled (T is small & static); steps >= max_len are predicated
    # off, so at loop exit h_ref holds the hidden state at step max_len - 1.
    h_ref[...] = jnp.zeros((B, H), dtype=jnp.float32)
    w_hh = w_hh_ref[...]                                  # load once, keep in vregs
    for t in range(T):
        @pl.when(t < max_len)
        def _(t=t):
            h_ref[...] = jnp.tanh(
                xproj_ref[pl.ds(t * B, B), :]
                + jnp.dot(h_ref[...], w_hh,
                          preferred_element_type=jnp.float32))
    # TODO(synk): pin W_hh in MXU weight registers (matmul_push_rhs/acc/pop)
    # for v5e/v6e; jnp.dot re-loads the RHS each step.

    # pad_packed_sequence zero-pads: rows shorter than max(ol_len) contribute
    # zeros at the last padded timestep.
    mask = (ol_len_ref[...] == max_len).astype(jnp.float32)        # [B, 1]

    # ---- rc_total folded into the heads: VPU multiply + lane reduce --------
    logit = (jnp.sum(topo_emb_ref[...] * v_topo_ref[...], axis=-1, keepdims=True)
             + jnp.sum(mc_ref[...] * v_mc_ref[...], axis=-1, keepdims=True)
             + jnp.sum(h_ref[...] * v_ol_ref[...], axis=-1, keepdims=True) * mask
             + b_eff_ref[0])
    out_ref[...] = jax.nn.sigmoid(logit)


def baseline_forward(params, mc, topo, ol_pad, ol_len):
    B, T = ol_pad.shape
    E = params['emb_topo'].shape[1]
    H = params['w_hh_t'].shape[0]
    mc_dim = mc.shape[1]

    # Embedding lookups are gathers — done as XLA glue outside the kernel.
    topo_emb = params['emb_topo'][topo]                              # [B, E]
    ol_emb = jnp.transpose(params['emb_ol'][ol_pad], (1, 0, 2))      # [T, B, E]
    ol_emb2d = ol_emb.reshape(T * B, E)                              # time-major rows

    ol_len_i = ol_len.astype(jnp.int32).reshape(B, 1)
    max_len = jnp.max(ol_len).astype(jnp.int32).reshape(1)

    # Fold rc_total (Linear(3,1)) into the three head weights (parameter
    # constant-folding, done once outside the kernel).
    w_tot = params['w_tot']                                          # [1, 3]
    v_topo = (params['w_topo_t'][:, 0] * w_tot[0, 0]).reshape(1, E)
    v_mc = (params['w_mc_t'][:, 0] * w_tot[0, 1]).reshape(1, mc_dim)
    v_ol = (params['w_ol_t'][:, 0] * w_tot[0, 2]).reshape(1, H)
    b_eff = (w_tot[0, 0] * params['b_topo'][0, 0]
             + w_tot[0, 1] * params['b_mc'][0, 0]
             + w_tot[0, 2] * params['b_ol'][0, 0]
             + params['b_tot'][0, 0]).reshape(1)

    vmem = pl.BlockSpec(memory_space=pltpu.MemorySpace.VMEM)
    smem = pl.BlockSpec(memory_space=pltpu.MemorySpace.SMEM)

    args = (max_len, ol_len_i, mc, topo_emb, ol_emb2d,
            params['w_ih_t'], params['w_hh_t'], params['b_rnn'],
            v_topo, v_mc, v_ol, b_eff)
    in_specs = [smem, vmem, vmem, vmem, vmem,
                vmem, vmem, vmem,
                vmem, vmem, vmem, smem]

    return pl.pallas_call(
        baseline_kernel,
        out_shape=jax.ShapeDtypeStruct((B, 1), jnp.float32),
        in_specs=in_specs,
        out_specs=vmem,
        scratch_shapes=[pltpu.VMEM((T * B, H), jnp.float32),   # xproj
                        pltpu.VMEM((B, H), jnp.float32)],      # hidden state
    )(*args)


def init_params(key, vocab_dim, mc_dim, topo_dim, embed_dim, hid_dim):
    ks = jax.random.split(key, 12)
    u = lambda k, shape, fan_in: jax.random.uniform(
        k, shape, jnp.float32, -1.0 / np.sqrt(fan_in), 1.0 / np.sqrt(fan_in))
    params = {
        # rc_mc: Linear(mc_dim, 1)
        'w_mc_t': u(ks[0], (mc_dim, 1), mc_dim),
        'b_mc': u(ks[1], (1, 1), mc_dim),
        # embedding_topo / rc_topo
        'emb_topo': jax.random.normal(ks[2], (topo_dim, embed_dim), jnp.float32),
        'w_topo_t': u(ks[3], (embed_dim, 1), embed_dim),
        'b_topo': u(ks[4], (1, 1), embed_dim),
        # embedding_ol / rnn
        'emb_ol': jax.random.normal(ks[5], (vocab_dim, embed_dim), jnp.float32),
        'w_ih_t': u(ks[6], (embed_dim, hid_dim), hid_dim),
        'w_hh_t': u(ks[7], (hid_dim, hid_dim), hid_dim),
        'b_rnn': u(ks[8], (1, hid_dim), hid_dim) + u(ks[9], (1, hid_dim), hid_dim),
        # rc_ol: Linear(hid_dim, 1)
        'w_ol_t': u(ks[10], (hid_dim, 1), hid_dim),
        'b_ol': jnp.zeros((1, 1), jnp.float32),
        # rc_total: Linear(3, 1)
        'w_tot': u(ks[11], (1, 3), 3),
        'b_tot': jnp.zeros((1, 1), jnp.float32),
    }
    return params


def reference_forward(params, mc, topo, ol_pad, ol_len):
    """Pure-JAX reference of the PyTorch forward (for verification)."""
    logit_mc = mc @ params['w_mc_t'] + params['b_mc']
    logit_topo = params['emb_topo'][topo] @ params['w_topo_t'] + params['b_topo']
    ol_emb = params['emb_ol'][ol_pad]                    # [B, T, E]
    B, T, _ = ol_emb.shape
    H = params['w_hh_t'].shape[0]
    h = jnp.zeros((B, H), jnp.float32)
    outs = []
    for t in range(T):
        h = jnp.tanh(ol_emb[:, t] @ params['w_ih_t']
                     + h @ params['w_hh_t'] + params['b_rnn'])
        outs.append(h)
    outs = jnp.stack(outs, axis=1)                       # [B, T, H]
    max_len = int(np.max(np.asarray(ol_len)))
    h_last = outs[:, max_len - 1, :] * (ol_len == max_len).astype(jnp.float32)[:, None]
    logit_ol = h_last @ params['w_ol_t'] + params['b_ol']
    cat = jnp.concatenate([logit_topo, logit_mc, logit_ol], axis=-1)
    return jax.nn.sigmoid(cat @ params['w_tot'].T + params['b_tot'])


if __name__ == "__main__":
    # Small shapes consistent with the module.
    B, T = 2, 8
    vocab_dim, mc_dim, topo_dim, embed_dim, hid_dim = 20, 8, 10, 32, 32

    key = jax.random.PRNGKey(0)
    kp, kmc, ktopo, kol = jax.random.split(key, 4)

    params = init_params(kp, vocab_dim, mc_dim, topo_dim, embed_dim, hid_dim)

    mc = jax.random.normal(kmc, (B, mc_dim), jnp.float32)
    topo = jax.random.randint(ktopo, (B,), 0, topo_dim)
    ol_pad = jax.random.randint(kol, (B, T), 0, vocab_dim)
    ol_len = jnp.array([T, 5], dtype=jnp.int32)          # max length == T

    out = baseline_forward(params, mc, topo, ol_pad, ol_len)
    out = jax.block_until_ready(out)

    ref = reference_forward(params, mc, topo, ol_pad, ol_len)
    np.testing.assert_allclose(np.asarray(out), np.asarray(ref),
                               rtol=1e-5, atol=1e-5)
    assert out.shape == (B, 1)
    print("KERNEL_OK")
</pallas_src>

<mosaic_0001>
module attributes {stable_mosaic.version = 11 : i64} {
  func.func @baseline_kernel(%arg0: memref<1xi32, #tpu.memory_space<smem>>, %arg1: memref<2x1xi32, #tpu.memory_space<vmem>>, %arg2: memref<2x8xf32, #tpu.memory_space<vmem>>, %arg3: memref<2x32xf32, #tpu.memory_space<vmem>>, %arg4: memref<16x32xf32, #tpu.memory_space<vmem>>, %arg5: memref<32x32xf32, #tpu.memory_space<vmem>>, %arg6: memref<32x32xf32, #tpu.memory_space<vmem>>, %arg7: memref<1x32xf32, #tpu.memory_space<vmem>>, %arg8: memref<1x32xf32, #tpu.memory_space<vmem>>, %arg9: memref<1x8xf32, #tpu.memory_space<vmem>>, %arg10: memref<1x32xf32, #tpu.memory_space<vmem>>, %arg11: memref<1xf32, #tpu.memory_space<smem>>, %arg12: memref<2x1xf32, #tpu.memory_space<vmem>>, %arg13: memref<16x32xf32, #tpu.memory_space<vmem>>, %arg14: memref<2x32xf32, #tpu.memory_space<vmem>>) attributes {dimension_semantics = [], scalar_prefetch = 0 : i64, scratch_operands = 2 : i64, tpu.core_type = #tpu.core_type<tc>} {
    %c0 = arith.constant 0 : index
    %0 = memref.load %arg0[%c0] : memref<1xi32, #tpu.memory_space<smem>>
    %c0_0 = arith.constant 0 : index
    %c0_1 = arith.constant 0 : index
    %1 = vector.load %arg4[%c0_0, %c0_1] : memref<16x32xf32, #tpu.memory_space<vmem>>, vector<16x32xf32>
    %c0_2 = arith.constant 0 : index
    %c0_3 = arith.constant 0 : index
    %2 = vector.load %arg5[%c0_2, %c0_3] : memref<32x32xf32, #tpu.memory_space<vmem>>, vector<32x32xf32>
    %cst = arith.constant dense<0.000000e+00> : vector<16x32xf32>
    %3 = tpu.matmul %1, %2, %cst {dimension_numbers = #tpu.dot_dimension_numbers<[1], [0], [0], [1], [0, 0, 1, 1], [], []>} : vector<16x32xf32>, vector<32x32xf32>, vector<16x32xf32> -> vector<16x32xf32>
    %c0_4 = arith.constant 0 : index
    %c0_5 = arith.constant 0 : index
    %4 = vector.load %arg7[%c0_4, %c0_5] : memref<1x32xf32, #tpu.memory_space<vmem>>, vector<1x32xf32>
    %5 = vector.broadcast %4 : vector<1x32xf32> to vector<16x32xf32>
    %6 = arith.addf %3, %5 : vector<16x32xf32>
    %c0_6 = arith.constant 0 : index
    %c0_7 = arith.constant 0 : index
    %7 = vector.load %arg13[%c0_6, %c0_7] : memref<16x32xf32, #tpu.memory_space<vmem>>, vector<16x32xf32>
    tpu.vector_store %arg13[%c0_6, %c0_7], %6 {strides = array<i32>} : memref<16x32xf32, #tpu.memory_space<vmem>>, vector<16x32xf32>,
    %cst_8 = arith.constant 0.000000e+00 : f32
    %8 = vector.broadcast %cst_8 : f32 to vector<2x32xf32>
    %c0_9 = arith.constant 0 : index
    %c0_10 = arith.constant 0 : index
    %9 = vector.load %arg14[%c0_9, %c0_10] : memref<2x32xf32, #tpu.memory_space<vmem>>, vector<2x32xf32>
    tpu.vector_store %arg14[%c0_9, %c0_10], %8 {strides = array<i32>} : memref<2x32xf32, #tpu.memory_space<vmem>>, vector<2x32xf32>,
    %c0_11 = arith.constant 0 : index
    %c0_12 = arith.constant 0 : index
    %10 = vector.load %arg6[%c0_11, %c0_12] : memref<32x32xf32, #tpu.memory_space<vmem>>, vector<32x32xf32>
    %c0_i32 = arith.constant 0 : i32
    %11 = arith.cmpi sgt, %0, %c0_i32 : i32
    %12 = arith.extui %11 : i1 to i32
    %c0_i32_13 = arith.constant 0 : i32
    %13 = arith.cmpi ne, %12, %c0_i32_13 : i32
    scf.if %13 {
      %c0_42 = arith.constant 0 : index
      %c0_43 = arith.constant 0 : index
      %70 = vector.load %arg13[%c0_42, %c0_43] : memref<16x32xf32, #tpu.memory_space<vmem>>, vector<2x32xf32>
      %c0_44 = arith.constant 0 : index
      %c0_45 = arith.constant 0 : index
      %71 = vector.load %arg14[%c0_44, %c0_45] : memref<2x32xf32, #tpu.memory_space<vmem>>, vector<2x32xf32>
      %cst_46 = arith.constant dense<0.000000e+00> : vector<2x32xf32>
      %72 = tpu.matmul %71, %10, %cst_46 {dimension_numbers = #tpu.dot_dimension_numbers<[1], [0], [0], [1], [0, 0, 1, 1], [], []>} : vector<2x32xf32>, vector<32x32xf32>, vector<2x32xf32> -> vector<2x32xf32>
      %73 = arith.addf %70, %72 : vector<2x32xf32>
      %74 = math.tanh %73 : vector<2x32xf32>
      %c0_47 = arith.constant 0 : index
      %c0_48 = arith.constant 0 : index
      %75 = vector.load %arg14[%c0_47, %c0_48] : memref<2x32xf32, #tpu.memory_space<vmem>>, vector<2x32xf32>
      tpu.vector_store %arg14[%c0_47, %c0_48], %74 {strides = array<i32>} : memref<2x32xf32, #tpu.memory_space<vmem>>, vector<2x32xf32>,
    } else {
    }
    %c1_i32 = arith.constant 1 : i32
    %14 = arith.cmpi sgt, %0, %c1_i32 : i32
    %15 = arith.extui %14 : i1 to i32
    %c0_i32_14 = arith.constant 0 : i32
    %16 = arith.cmpi ne, %15, %c0_i32_14 : i32
    scf.if %16 {
      %c2 = arith.constant 2 : index
      %c0_42 = arith.constant 0 : index
      %70 = vector.load %arg13[%c2, %c0_42] : memref<16x32xf32, #tpu.memory_space<vmem>>, vector<2x32xf32>
      %c0_43 = arith.constant 0 : index
      %c0_44 = arith.constant 0 : index
      %71 = vector.load %arg14[%c0_43, %c0_44] : memref<2x32xf32, #tpu.memory_space<vmem>>, vector<2x32xf32>
      %cst_45 = arith.constant dense<0.000000e+00> : vector<2x32xf32>
      %72 = tpu.matmul %71, %10, %cst_45 {dimension_numbers = #tpu.dot_dimension_numbers<[1], [0], [0], [1], [0, 0, 1, 1], [], []>} : vector<2x32xf32>, vector<32x32xf32>, vector<2x32xf32> -> vector<2x32xf32>
      %73 = arith.addf %70, %72 : vector<2x32xf32>
      %74 = math.tanh %73 : vector<2x32xf32>
      %c0_46 = arith.constant 0 : index
      %c0_47 = arith.constant 0 : index
      %75 = vector.load %arg14[%c0_46, %c0_47] : memref<2x32xf32, #tpu.memory_space<vmem>>, vector<2x32xf32>
      tpu.vector_store %arg14[%c0_46, %c0_47], %74 {strides = array<i32>} : memref<2x32xf32, #tpu.memory_space<vmem>>, vector<2x32xf32>,
    } else {
    }
    %c2_i32 = arith.constant 2 : i32
    %17 = arith.cmpi sgt, %0, %c2_i32 : i32
    %18 = arith.extui %17 : i1 to i32
    %c0_i32_15 = arith.constant 0 : i32
    %19 = arith.cmpi ne, %18, %c0_i32_15 : i32
    scf.if %19 {
      %c4 = arith.constant 4 : index
      %c0_42 = arith.constant 0 : index
      %70 = vector.load %arg13[%c4, %c0_42] : memref<16x32xf32, #tpu.memory_space<vmem>>, vector<2x32xf32>
      %c0_43 = arith.constant 0 : index
      %c0_44 = arith.constant 0 : index
      %71 = vector.load %arg14[%c0_43, %c0_44] : memref<2x32xf32, #tpu.memory_space<vmem>>, vector<2x32xf32>
      %cst_45 = arith.constant dense<0.000000e+00> : vector<2x32xf32>
      %72 = tpu.matmul %71, %10, %cst_45 {dimension_numbers = #tpu.dot_dimension_numbers<[1], [0], [0], [1], [0, 0, 1, 1], [], []>} : vector<2x32xf32>, vector<32x32xf32>, vector<2x32xf32> -> vector<2x32xf32>
      %73 = arith.addf %70, %72 : vector<2x32xf32>
      %74 = math.tanh %73 : vector<2x32xf32>
      %c0_46 = arith.constant 0 : index
      %c0_47 = arith.constant 0 : index
      %75 = vector.load %arg14[%c0_46, %c0_47] : memref<2x32xf32, #tpu.memory_space<vmem>>, vector<2x32xf32>
      tpu.vector_store %arg14[%c0_46, %c0_47], %74 {strides = array<i32>} : memref<2x32xf32, #tpu.memory_space<vmem>>, vector<2x32xf32>,
    } else {
    }
    %c3_i32 = arith.constant 3 : i32
    %20 = arith.cmpi sgt, %0, %c3_i32 : i32
    %21 = arith.extui %20 : i1 to i32
    %c0_i32_16 = arith.constant 0 : i32
    %22 = arith.cmpi ne, %21, %c0_i32_16 : i32
    scf.if %22 {
      %c6 = arith.constant 6 : index
      %c0_42 = arith.constant 0 : index
      %70 = vector.load %arg13[%c6, %c0_42] : memref<16x32xf32, #tpu.memory_space<vmem>>, vector<2x32xf32>
      %c0_43 = arith.constant 0 : index
      %c0_44 = arith.constant 0 : index
      %71 = vector.load %arg14[%c0_43, %c0_44] : memref<2x32xf32, #tpu.memory_space<vmem>>, vector<2x32xf32>
      %cst_45 = arith.constant dense<0.000000e+00> : vector<2x32xf32>
      %72 = tpu.matmul %71, %10, %cst_45 {dimension_numbers = #tpu.dot_dimension_numbers<[1], [0], [0], [1], [0, 0, 1, 1], [], []>} : vector<2x32xf32>, vector<32x32xf32>, vector<2x32xf32> -> vector<2x32xf32>
      %73 = arith.addf %70, %72 : vector<2x32xf32>
      %74 = math.tanh %73 : vector<2x32xf32>
      %c0_46 = arith.constant 0 : index
      %c0_47 = arith.constant 0 : index
      %75 = vector.load %arg14[%c0_46, %c0_47] : memref<2x32xf32, #tpu.memory_space<vmem>>, vector<2x32xf32>
      tpu.vector_store %arg14[%c0_46, %c0_47], %74 {strides = array<i32>} : memref<2x32xf32, #tpu.memory_space<vmem>>, vector<2x32xf32>,
    } else {
    }
    %c4_i32 = arith.constant 4 : i32
    %23 = arith.cmpi sgt, %0, %c4_i32 : i32
    %24 = arith.extui %23 : i1 to i32
    %c0_i32_17 = arith.constant 0 : i32
    %25 = arith.cmpi ne, %24, %c0_i32_17 : i32
    scf.if %25 {
      %c8 = arith.constant 8 : index
      %c0_42 = arith.constant 0 : index
      %70 = vector.load %arg13[%c8, %c0_42] : memref<16x32xf32, #tpu.memory_space<vmem>>, vector<2x32xf32>
      %c0_43 = arith.constant 0 : index
      %c0_44 = arith.constant 0 : index
      %71 = vector.load %arg14[%c0_43, %c0_44] : memref<2x32xf32, #tpu.memory_space<vmem>>, vector<2x32xf32>
      %cst_45 = arith.constant dense<0.000000e+00> : vector<2x32xf32>
      %72 = tpu.matmul %71, %10, %cst_45 {dimension_numbers = #tpu.dot_dimension_numbers<[1], [0], [0], [1], [0, 0, 1, 1], [], []>} : vector<2x32xf32>, vector<32x32xf32>, vector<2x32xf32> -> vector<2x32xf32>
      %73 = arith.addf %70, %72 : vector<2x32xf32>
      %74 = math.tanh %73 : vector<2x32xf32>
      %c0_46 = arith.constant 0 : index
      %c0_47 = arith.constant 0 : index
      %75 = vector.load %arg14[%c0_46, %c0_47] : memref<2x32xf32, #tpu.memory_space<vmem>>, vector<2x32xf32>
      tpu.vector_store %arg14[%c0_46, %c0_47], %74 {strides = array<i32>} : memref<2x32xf32, #tpu.memory_space<vmem>>, vector<2x32xf32>,
    } else {
    }
    %c5_i32 = arith.constant 5 : i32
    %26 = arith.cmpi sgt, %0, %c5_i32 : i32
    %27 = arith.extui %26 : i1 to i32
    %c0_i32_18 = arith.constant 0 : i32
    %28 = arith.cmpi ne, %27, %c0_i32_18 : i32
    scf.if %28 {
      %c10 = arith.constant 10 : index
      %c0_42 = arith.constant 0 : index
      %70 = vector.load %arg13[%c10, %c0_42] : memref<16x32xf32, #tpu.memory_space<vmem>>, vector<2x32xf32>
      %c0_43 = arith.constant 0 : index
      %c0_44 = arith.constant 0 : index
      %71 = vector.load %arg14[%c0_43, %c0_44] : memref<2x32xf32, #tpu.memory_space<vmem>>, vector<2x32xf32>
      %cst_45 = arith.constant dense<0.000000e+00> : vector<2x32xf32>
      %72 = tpu.matmul %71, %10, %cst_45 {dimension_numbers = #tpu.dot_dimension_numbers<[1], [0], [0], [1], [0, 0, 1, 1], [], []>} : vector<2x32xf32>, vector<32x32xf32>, vector<2x32xf32> -> vector<2x32xf32>
      %73 = arith.addf %70, %72 : vector<2x32xf32>
      %74 = math.tanh %73 : vector<2x32xf32>
      %c0_46 = arith.constant 0 : index
      %c0_47 = arith.constant 0 : index
      %75 = vector.load %arg14[%c0_46, %c0_47] : memref<2x32xf32, #tpu.memory_space<vmem>>, vector<2x32xf32>
      tpu.vector_store %arg14[%c0_46, %c0_47], %74 {strides = array<i32>} : memref<2x32xf32, #tpu.memory_space<vmem>>, vector<2x32xf32>,
    } else {
    }
    %c6_i32 = arith.constant 6 : i32
    %29 = arith.cmpi sgt, %0, %c6_i32 : i32
    %30 = arith.extui %29 : i1 to i32
    %c0_i32_19 = arith.constant 0 : i32
    %31 = arith.cmpi ne, %30, %c0_i32_19 : i32
    scf.if %31 {
      %c12 = arith.constant 12 : index
      %c0_42 = arith.constant 0 : index
      %70 = vector.load %arg13[%c12, %c0_42] : memref<16x32xf32, #tpu.memory_space<vmem>>, vector<2x32xf32>
      %c0_43 = arith.constant 0 : index
      %c0_44 = arith.constant 0 : index
      %71 = vector.load %arg14[%c0_43, %c0_44] : memref<2x32xf32, #tpu.memory_space<vmem>>, vector<2x32xf32>
      %cst_45 = arith.constant dense<0.000000e+00> : vector<2x32xf32>
      %72 = tpu.matmul %71, %10, %cst_45 {dimension_numbers = #tpu.dot_dimension_numbers<[1], [0], [0], [1], [0, 0, 1, 1], [], []>} : vector<2x32xf32>, vector<32x32xf32>, vector<2x32xf32> -> vector<2x32xf32>
      %73 = arith.addf %70, %72 : vector<2x32xf32>
      %74 = math.tanh %73 : vector<2x32xf32>
      %c0_46 = arith.constant 0 : index
      %c0_47 = arith.constant 0 : index
      %75 = vector.load %arg14[%c0_46, %c0_47] : memref<2x32xf32, #tpu.memory_space<vmem>>, vector<2x32xf32>
      tpu.vector_store %arg14[%c0_46, %c0_47], %74 {strides = array<i32>} : memref<2x32xf32, #tpu.memory_space<vmem>>, vector<2x32xf32>,
    } else {
    }
    %c7_i32 = arith.constant 7 : i32
    %32 = arith.cmpi sgt, %0, %c7_i32 : i32
    %33 = arith.extui %32 : i1 to i32
    %c0_i32_20 = arith.constant 0 : i32
    %34 = arith.cmpi ne, %33, %c0_i32_20 : i32
    scf.if %34 {
      %c14 = arith.constant 14 : index
      %c0_42 = arith.constant 0 : index
      %70 = vector.load %arg13[%c14, %c0_42] : memref<16x32xf32, #tpu.memory_space<vmem>>, vector<2x32xf32>
      %c0_43 = arith.constant 0 : index
      %c0_44 = arith.constant 0 : index
      %71 = vector.load %arg14[%c0_43, %c0_44] : memref<2x32xf32, #tpu.memory_space<vmem>>, vector<2x32xf32>
      %cst_45 = arith.constant dense<0.000000e+00> : vector<2x32xf32>
      %72 = tpu.matmul %71, %10, %cst_45 {dimension_numbers = #tpu.dot_dimension_numbers<[1], [0], [0], [1], [0, 0, 1, 1], [], []>} : vector<2x32xf32>, vector<32x32xf32>, vector<2x32xf32> -> vector<2x32xf32>
      %73 = arith.addf %70, %72 : vector<2x32xf32>
      %74 = math.tanh %73 : vector<2x32xf32>
      %c0_46 = arith.constant 0 : index
      %c0_47 = arith.constant 0 : index
      %75 = vector.load %arg14[%c0_46, %c0_47] : memref<2x32xf32, #tpu.memory_space<vmem>>, vector<2x32xf32>
      tpu.vector_store %arg14[%c0_46, %c0_47], %74 {strides = array<i32>} : memref<2x32xf32, #tpu.memory_space<vmem>>, vector<2x32xf32>,
    } else {
    }
    %c0_21 = arith.constant 0 : index
    %c0_22 = arith.constant 0 : index
    %35 = vector.load %arg1[%c0_21, %c0_22] : memref<2x1xi32, #tpu.memory_space<vmem>>, vector<2x1xi32>
    %36 = vector.broadcast %0 : i32 to vector<2x1xi32>
    %37 = arith.cmpi eq, %35, %36 : vector<2x1xi32>
    %38 = arith.extui %37 : vector<2x1xi1> to vector<2x1xi32>
    %39 = arith.sitofp %38 : vector<2x1xi32> to vector<2x1xf32>
    %c0_23 = arith.constant 0 : index
    %c0_24 = arith.constant 0 : index
    %40 = vector.load %arg3[%c0_23, %c0_24] : memref<2x32xf32, #tpu.memory_space<vmem>>, vector<2x32xf32>
    %c0_25 = arith.constant 0 : index
    %c0_26 = arith.constant 0 : index
    %41 = vector.load %arg8[%c0_25, %c0_26] : memref<1x32xf32, #tpu.memory_space<vmem>>, vector<1x32xf32>
    %42 = vector.broadcast %41 : vector<1x32xf32> to vector<2x32xf32>
    %43 = arith.mulf %40, %42 : vector<2x32xf32>
    %cst_27 = arith.constant dense<0.000000e+00> : vector<2xf32>
    %44 = vector.multi_reduction <add>, %43, %cst_27 [1] : vector<2x32xf32> to vector<2xf32>
    %45 = vector.shape_cast %44 : vector<2xf32> to vector<2x1xf32>
    %c0_28 = arith.constant 0 : index
    %c0_29 = arith.constant 0 : index
    %46 = vector.load %arg2[%c0_28, %c0_29] : memref<2x8xf32, #tpu.memory_space<vmem>>, vector<2x8xf32>
    %c0_30 = arith.constant 0 : index
    %c0_31 = arith.constant 0 : index
    %47 = vector.load %arg9[%c0_30, %c0_31] : memref<1x8xf32, #tpu.memory_space<vmem>>, vector<1x8xf32>
    %48 = vector.broadcast %47 : vector<1x8xf32> to vector<2x8xf32>
    %49 = arith.mulf %46, %48 : vector<2x8xf32>
    %cst_32 = arith.constant dense<0.000000e+00> : vector<2xf32>
    %50 = vector.multi_reduction <add>, %49, %cst_32 [1] : vector<2x8xf32> to vector<2xf32>
    %51 = vector.shape_cast %50 : vector<2xf32> to vector<2x1xf32>
    %52 = arith.addf %45, %51 : vector<2x1xf32>
    %c0_33 = arith.constant 0 : index
    %c0_34 = arith.constant 0 : index
    %53 = vector.load %arg14[%c0_33, %c0_34] : memref<2x32xf32, #tpu.memory_space<vmem>>, vector<2x32xf32>
    %c0_35 = arith.constant 0 : index
    %c0_36 = arith.constant 0 : index
    %54 = vector.load %arg10[%c0_35, %c0_36] : memref<1x32xf32, #tpu.memory_space<vmem>>, vector<1x32xf32>
    %55 = vector.broadcast %54 : vector<1x32xf32> to vector<2x32xf32>
    %56 = arith.mulf %53, %55 : vector<2x32xf32>
    %cst_37 = arith.constant dense<0.000000e+00> : vector<2xf32>
    %57 = vector.multi_reduction <add>, %56, %cst_37 [1] : vector<2x32xf32> to vector<2xf32>
    %58 = vector.shape_cast %57 : vector<2xf32> to vector<2x1xf32>
    %59 = arith.mulf %58, %39 : vector<2x1xf32>
    %60 = arith.addf %52, %59 : vector<2x1xf32>
    %c0_38 = arith.constant 0 : index
    %61 = memref.load %arg11[%c0_38] : memref<1xf32, #tpu.memory_space<smem>>
    %62 = vector.broadcast %61 : f32 to vector<2x1xf32>
    %63 = arith.addf %60, %62 : vector<2x1xf32>
    %64 = arith.negf %63 : vector<2x1xf32>
    %65 = math.exp %64 : vector<2x1xf32>
    %cst_39 = arith.constant 1.000000e+00 : f32
    %66 = vector.broadcast %cst_39 : f32 to vector<2x1xf32>
    %67 = arith.addf %66, %65 : vector<2x1xf32>
    %68 = arith.divf %66, %67 : vector<2x1xf32>
    %c0_40 = arith.constant 0 : index
    %c0_41 = arith.constant 0 : index
    %69 = vector.load %arg12[%c0_40, %c0_41] : memref<2x1xf32, #tpu.memory_space<vmem>>, vector<2x1xf32>
    tpu.vector_store %arg12[%c0_40, %c0_41], %68 {strides = array<i32>} : memref<2x1xf32, #tpu.memory_space<vmem>>, vector<2x1xf32>,
    return
  }
}

</mosaic_0001>

<bundles_post_ra>
// kernel: tpu_custom_call.1
= control target key start
LH: loop header
LB: loop body
LE: loop exit
PB: predicated region body
PF: predicated region fallthrough
CT: control target
= control target key end

     0   :  { %s1458_s0 = inlined_call_operand.<no memory space> [shape: s32[1], index: 0, kind: input, shape index: {}]   ;;  %s1459_s1 = inlined_call_operand.vmem [shape: s32[2,1], index: 1, kind: input, shape index: {}]   ;;  %s1460_s2 = inlined_call_operand.vmem [shape: f32[2,8], index: 2, kind: input, shape index: {}]   ;;  %s1461_s3 = inlined_call_operand.vmem [shape: f32[2,32], index: 3, kind: input, shape index: {}]   ;;  %s1462_s4 = inlined_call_operand.vmem [shape: f32[16,32], index: 4, kind: input, shape index: {}]   ;;  %s1463_s5 = inlined_call_operand.hbm [shape: f32[32,32], index: 5, kind: input, shape index: {}]   ;;  %s1464_s6 = inlined_call_operand.hbm [shape: f32[32,32], index: 6, kind: input, shape index: {}]   ;;  %s1465_s7 = inlined_call_operand.vmem [shape: f32[1,32], index: 7, kind: input, shape index: {}]   ;;  %s1466_s8 = inlined_call_operand.vmem [shape: f32[1,32], index: 8, kind: input, shape index: {}]   ;;  %s1467_s9 = inlined_call_operand.vmem [shape: f32[1,8], index: 9, kind: input, shape index: {}]   ;;  %s1468_s10 = inlined_call_operand.vmem [shape: f32[1,32], index: 10, kind: input, shape index: {}]   ;;  %s1469_s11 = inlined_call_operand.<no memory space> [shape: f32[1], index: 11, kind: input, shape index: {}]   ;;  %s1470_s12 = inlined_call_operand.vmem [shape: f32[2,1], index: 12, kind: output, shape index: {}]  }
   0x1   :  { %18 = sst [smem:[#allocation5]] %s1469_s11 }
   0x2   :  { %19 = vsyncpa [#allocation7], 0 }
   0x3   :  { %20 = vsyncpa [#allocation9], 0  ;;  %s1215_s23 = smov [#allocation6]   ;;  %s1167_s27 = scalar_lea.hbm %s1463_s5, 512 }
   0x4   :  { %s36_s24 = sshll.u32 %s1215_s23, 4  ;;  %p1168_p0 = scmp.ne.s32.totalorder %s1463_s5, %s1167_s27  ;;  %s37_s24 = int_to_ptr.vmem [resolvable:$true] %s36_s24 }
   0x5   :  { %p1171_p1 = scmp.lt.u32.totalorder %s1167_s27, %s1463_s5 }
   0x7   :  { %p1173_p2 = pnand %p1171_p1, %p1168_p0 }
   0x9   :  { %1176 = shalt.err (!%p1173_p2)
}
   0xa   :  { %s1177_s11 = scalar_lea.vmem %s37_s24, 512  ;;  %p1182_p4 = scmp.lt.s32.totalorder %s37_s24, %s37_s24 }
   0xb   :  { %p1178_p3 = scmp.ne.s32.totalorder %s37_s24, %s1177_s11  ;;  %p1183_p5 = scmp.lt.s32.totalorder %s1177_s11, %s1177_s11 }
   0xd   :  { %p1184_p6 = por %p1183_p5, %p1182_p4 }
   0xf   :  { %p1185_p7 = pnand %p1184_p6, %p1178_p3 }
  0x11   :  { %1188 = shalt.err (!%p1185_p7)
}
  0x12   :  { %s1216_s14 = smov 128   ;;  %s1217_s15 = smov 8  }
  0x13   :  { %42 = dma.hbm_to_vmem [thread:$0]  %s1463_s5, 512, %s37_s24, [#allocation7], %s1216_s14, %s1216_s14, %s1217_s15  }
  0x14   :  { %s1218_s18 = smov [#allocation8]   ;;  %s1189_s22 = scalar_lea.hbm %s1464_s6, 512 }
  0x15   :  { %s48_s19 = sshll.u32 %s1218_s18, 4  ;;  %p1190_p8 = scmp.ne.s32.totalorder %s1464_s6, %s1189_s22  ;;  %s49_s19 = int_to_ptr.vmem [resolvable:$true] %s48_s19 }
  0x16   :  { %p1193_p9 = scmp.lt.u32.totalorder %s1189_s22, %s1464_s6 }
  0x18   :  { %p1195_p10 = pnand %p1193_p9, %p1190_p8 }
  0x1a   :  { %1198 = shalt.err (!%p1195_p10)
}
  0x1b   :  { %s1199_s28 = scalar_lea.vmem %s49_s19, 512  ;;  %p1204_p12 = scmp.lt.s32.totalorder %s49_s19, %s49_s19 }
  0x1c   :  { %p1200_p11 = scmp.ne.s32.totalorder %s49_s19, %s1199_s28  ;;  %p1205_p13 = scmp.lt.s32.totalorder %s1199_s28, %s1199_s28 }
  0x1e   :  { %p1206_p0 = por %p1205_p13, %p1204_p12 }
  0x20   :  { %p1207_p1 = pnand %p1206_p0, %p1200_p11 }
  0x22   :  { %1210 = shalt.err (!%p1207_p1)
}
  0x23   :  { %54 = dma.hbm_to_vmem [thread:$0]  %s1464_s6, 512, %s49_s19, [#allocation9], %s1216_s14, %s1216_s14, %s1217_s15  }
  0x24   :  { %1211 = dma.done.wait [#allocation7], 512  }
  0x25   :  { %1212 = vsyncadd [#allocation7], 4294966784 }
  0x26   :  { %1213 = dma.done.wait [#allocation9], 512  }
  0x27   :  { %1214 = vsyncadd [#allocation9], 4294966784  ;;  %vm169_vm0 = vcmask 254976   ;;  %v1219_v0 = vmov 0.0   ;;  %v1338_v1 = vld [vmem:[#allocation8] sm:$0xff]  ;;  %v1340_v2 = vld [vmem:[#allocation8 + $0x8] sm:$0xff] }
  0x28   :  { %170 = vst.msk [vmem:[#allocation3] sm:$0x3] %vm169_vm0, %v1219_v0  ;;  %v1342_v3 = vld [vmem:[#allocation8 + $0x10] sm:$0xff]  ;;  %vm85_vm1 = vcmask 261120   ;;  %v1344_v4 = vld [vmem:[#allocation8 + $0x18] sm:$0xff]  ;;  %v74_v5 = vld [vmem:[#allocation6] sm:$0xff] }
  0x29   :  { %v75_v6 = vld [vmem:[#allocation6 + $0x8] sm:$0xff]  ;;  %v76_v8 = vld [vmem:[#allocation6 + $0x10] sm:$0xff]  ;;  %v77_v9 = vld [vmem:[#allocation6 + $0x18] sm:$0xff]  ;;  %p896_p2 = scmp.le.s32.totalorder %s1458_s0, 0 }
  0x2a   :  { %v1062_v7 = vpack.c.bf16 %v75_v6, %v74_v5  ;;  %v72_v10 = vld [vmem:[%s1462_s4] sm:$0xff]  ;;  %v1066_v11 = vpack.c.bf16 %v77_v9, %v76_v8  ;;  %v73_v12 = vld [vmem:[%s1462_s4 + $0x8] sm:$0xff]  ;;  %v1071_v18 = vpack.c.bf16 (!%p896_p2), %v1340_v2, %v1338_v1  ;;  %v1220_v19 = vmov (!%p896_p2), 0.0|0.0  }
  0x2b   :  { %971 = vmatprep.mubr.msk.f32.mxu0 %vm85_vm1, %v72_v10  ;;  %v893_v13 = vld [vmem:[%s1465_s7] ss:$0 sm:$0xff]  ;;  %v1074_v20 = vpack.c.bf16 (!%p896_p2), %v1344_v4, %v1342_v3  ;;  %vm1221_vm2 = vmmov (!%p896_p2), 0   ;;  %v1222_v21 = vmov (!%p896_p2), 0.0  }
  0x2c   :  { %1063 = vmatprep.subr.bf16.mxu0 %v1062_v7 }
  0x2d   :  { %1065 = vmatpush3.bf16.msra.mxu0 %v1062_v7 }
  0x2e   :  { %1067 = vmatprep.subr.bf16.mxu0 %v1066_v11 }
  0x2f   :  { %v180_v22 = vld [vmem:[#allocation3] sm:$0x3] (!%p896_p2) }
  0x31   :  { %1069 = vmatpush3.bf16.msra.mxu0 %v1066_v11 }
  0x32   :  { %1070 = vmatprep.subr.bf16.mxu0 (!%p896_p2), %v1220_v19 }
  0x34   :  { %972 = vmatmul.mubr.msk.f32.vlgmr.msra.gmra.mrb[0].mxu0 %vm85_vm1, %v73_v12 }
  0x35   :  { %1072 = vmatpush3.bf16.msra.mxu0 (!%p896_p2), %v1071_v18  ;;  %982 = vmatprep.mubr.msk.f32.mxu0 (!%p896_p2), %vm1221_vm2, %v1222_v21 }
  0x36   :  { %1073 = vmatprep.subr.bf16.mxu0 (!%p896_p2), %v1220_v19 }
  0x39   :  { %1075 = vmatpush3.bf16.msra.mxu0 (!%p896_p2), %v1074_v20 }
 0x105   :  { %178 = sbr.rel (%p896_p2) target bundleno = 490 (0x1ea), region = 61 }
 0x107   :  { %v973_v14 = vpop.f32.mrb[0].mxu0 }
 0x108   :  { %v164_v15 = vadd.f32 %v973_v14, %v893_v13  ;;  %v158_v16 = vpop.f32.mrb[1].mxu0  ;;  %983 = vmatmul.mubr.msk.f32.vlgmr.msra.gmra.mrb[0].mxu0 (!%p896_p2), %vm85_vm1, %v180_v22 }
 0x109   :  { %v159_v17 = vadd.f32 %v893_v13, %v158_v16 }
 0x10a   :  { %168 = vst.msk [vmem:[#allocation2 + $0x8] sm:$0xff] %vm85_vm1, %v164_v15 }
 0x10b   :  { %167 = vst.msk [vmem:[#allocation2] sm:$0xff] %vm85_vm1, %v159_v17 }
 0x112   :  { %v179_v23 = vld [vmem:[#allocation2] sm:$0x3] }
 0x1db   :  { %v250_v24 = vpop.f32.mrb[0].mxu0 }
 0x1dc   :  { %v254_v25 = vadd.f32 %v250_v24, %v179_v23  ;;  %v984_v26 = vpop.f32.mrb[1].mxu0 }
 0x1de   :  { %1147 = vtanh.f32 %v254_v25 }
 0x1e8   :  { %v1148_v27 = vpop.eup %1147 }
 0x1e9   :  { %256 = vst.msk [vmem:[#allocation3] sm:$0x3] %vm169_vm0, %v1148_v27 }
 0x1ea PF:  { %p898_p3 = scmp.le.s32.totalorder %s1458_s0, 1 }
 0x1eb   :  { %v1077_v28 = vpack.c.bf16 (!%p898_p3), %v1340_v2, %v1338_v1  ;;  %v1223_v29 = vmov (!%p898_p3), 0.0|0.0   ;;  %v1080_v30 = vpack.c.bf16 (!%p898_p3), %v1344_v4, %v1342_v3  ;;  %vm1224_vm3 = vmmov (!%p898_p3), 0  }
 0x1ec   :  { %260 = sbr.rel (%p898_p3) target bundleno = 726 (0x2d6), region = 65  ;;  %1076 = vmatprep.subr.bf16.mxu0 (!%p898_p3), %v1223_v29  ;;  %v1225_v31 = vmov (!%p898_p3), 0.0  }
 0x1ed   :  { %1078 = vmatpush3.bf16.msra.mxu0 (!%p898_p3), %v1077_v28  ;;  %993 = vmatprep.mubr.msk.f32.mxu0 (!%p898_p3), %vm1224_vm3, %v1225_v31 }
 0x1ee   :  { %1079 = vmatprep.subr.bf16.mxu0 (!%p898_p3), %v1223_v29 }
 0x1f0   :  { %v262_v32 = vld [vmem:[#allocation3] sm:$0x3] (!%p898_p3)  ;;  %v261_v33 = vld [vmem:[#allocation2 + $0x2] sm:$0x3] (!%p898_p3) }
 0x1f1   :  { %1081 = vmatpush3.bf16.msra.mxu0 (!%p898_p3), %v1080_v30 }
 0x1f4   :  { %994 = vmatmul.mubr.msk.f32.vlgmr.msra.gmra.mrb[0].mxu0 %vm85_vm1, %v262_v32 }
 0x2c7   :  { %v332_v34 = vpop.f32.mrb[0].mxu0 }
 0x2c8   :  { %v336_v35 = vadd.f32 %v332_v34, %v261_v33  ;;  %v995_v36 = vpop.f32.mrb[1].mxu0 }
 0x2ca   :  { %1149 = vtanh.f32 %v336_v35 }
 0x2d4   :  { %v1150_v37 = vpop.eup %1149 }
 0x2d5   :  { %338 = vst.msk [vmem:[#allocation3] sm:$0x3] %vm169_vm0, %v1150_v37 }
 0x2d6 PF:  { %p900_p4 = scmp.le.s32.totalorder %s1458_s0, 2 }
 0x2d7   :  { %v1083_v38 = vpack.c.bf16 (!%p900_p4), %v1340_v2, %v1338_v1  ;;  %v1226_v39 = vmov (!%p900_p4), 0.0|0.0   ;;  %v1086_v40 = vpack.c.bf16 (!%p900_p4), %v1344_v4, %v1342_v3  ;;  %vm1227_vm4 = vmmov (!%p900_p4), 0   ;;  %v343_v43 = vld [vmem:[#allocation2 + $0x4] sm:$0x3] (!%p900_p4) }
 0x2d8   :  { %342 = sbr.rel (%p900_p4) target bundleno = 962 (0x3c2), region = 69  ;;  %1082 = vmatprep.subr.bf16.mxu0 (!%p900_p4), %v1226_v39  ;;  %v1228_v41 = vmov (!%p900_p4), 0.0  }
 0x2d9   :  { %1084 = vmatpush3.bf16.msra.mxu0 (!%p900_p4), %v1083_v38  ;;  %1004 = vmatprep.mubr.msk.f32.mxu0 (!%p900_p4), %vm1227_vm4, %v1228_v41 }
 0x2da   :  { %1085 = vmatprep.subr.bf16.mxu0 (!%p900_p4), %v1226_v39 }
 0x2dc   :  { %v344_v42 = vld [vmem:[#allocation3] sm:$0x3] (!%p900_p4) }
 0x2dd   :  { %1087 = vmatpush3.bf16.msra.mxu0 (!%p900_p4), %v1086_v40 }
 0x2e0   :  { %1005 = vmatmul.mubr.msk.f32.vlgmr.msra.gmra.mrb[0].mxu0 %vm85_vm1, %v344_v42 }
 0x3b3   :  { %v414_v44 = vpop.f32.mrb[0].mxu0 }
 0x3b4   :  { %v418_v45 = vadd.f32 %v414_v44, %v343_v43  ;;  %v1006_v46 = vpop.f32.mrb[1].mxu0 }
 0x3b6   :  { %1151 = vtanh.f32 %v418_v45 }
 0x3c0   :  { %v1152_v47 = vpop.eup %1151 }
 0x3c1   :  { %420 = vst.msk [vmem:[#allocation3] sm:$0x3] %vm169_vm0, %v1152_v47 }
 0x3c2 PF:  { %p902_p5 = scmp.le.s32.totalorder %s1458_s0, 3 }
 0x3c3   :  { %v1089_v48 = vpack.c.bf16 (!%p902_p5), %v1340_v2, %v1338_v1  ;;  %v1229_v49 = vmov (!%p902_p5), 0.0|0.0   ;;  %v1092_v50 = vpack.c.bf16 (!%p902_p5), %v1344_v4, %v1342_v3  ;;  %vm1230_vm5 = vmmov (!%p902_p5), 0   ;;  %v425_v53 = vld [vmem:[#allocation2 + $0x6] sm:$0x3] (!%p902_p5) }
 0x3c4   :  { %424 = sbr.rel (%p902_p5) target bundleno = 1198 (0x4ae), region = 73  ;;  %1088 = vmatprep.subr.bf16.mxu0 (!%p902_p5), %v1229_v49  ;;  %v1231_v51 = vmov (!%p902_p5), 0.0  }
 0x3c5   :  { %1090 = vmatpush3.bf16.msra.mxu0 (!%p902_p5), %v1089_v48  ;;  %1015 = vmatprep.mubr.msk.f32.mxu0 (!%p902_p5), %vm1230_vm5, %v1231_v51 }
 0x3c6   :  { %1091 = vmatprep.subr.bf16.mxu0 (!%p902_p5), %v1229_v49 }
 0x3c8   :  { %v426_v52 = vld [vmem:[#allocation3] sm:$0x3] (!%p902_p5) }
 0x3c9   :  { %1093 = vmatpush3.bf16.msra.mxu0 (!%p902_p5), %v1092_v50 }
 0x3cc   :  { %1016 = vmatmul.mubr.msk.f32.vlgmr.msra.gmra.mrb[0].mxu0 %vm85_vm1, %v426_v52 }
 0x49f   :  { %v496_v54 = vpop.f32.mrb[0].mxu0 }
 0x4a0   :  { %v500_v55 = vadd.f32 %v496_v54, %v425_v53  ;;  %v1017_v56 = vpop.f32.mrb[1].mxu0 }
 0x4a2   :  { %1153 = vtanh.f32 %v500_v55 }
 0x4ac   :  { %v1154_v57 = vpop.eup %1153 }
 0x4ad   :  { %502 = vst.msk [vmem:[#allocation3] sm:$0x3] %vm169_vm0, %v1154_v57 }
 0x4ae PF:  { %p904_p6 = scmp.le.s32.totalorder %s1458_s0, 4 }
 0x4af   :  { %v1095_v58 = vpack.c.bf16 (!%p904_p6), %v1340_v2, %v1338_v1  ;;  %v1232_v59 = vmov (!%p904_p6), 0.0|0.0   ;;  %v1098_v60 = vpack.c.bf16 (!%p904_p6), %v1344_v4, %v1342_v3  ;;  %vm1233_vm6 = vmmov (!%p904_p6), 0   ;;  %v507_v63 = vld [vmem:[#allocation2 + $0x8] sm:$0x3] (!%p904_p6) }
 0x4b0   :  { %506 = sbr.rel (%p904_p6) target bundleno = 1434 (0x59a), region = 77  ;;  %1094 = vmatprep.subr.bf16.mxu0 (!%p904_p6), %v1232_v59  ;;  %v1234_v61 = vmov (!%p904_p6), 0.0  }
 0x4b1   :  { %1096 = vmatpush3.bf16.msra.mxu0 (!%p904_p6), %v1095_v58  ;;  %1026 = vmatprep.mubr.msk.f32.mxu0 (!%p904_p6), %vm1233_vm6, %v1234_v61 }
 0x4b2   :  { %1097 = vmatprep.subr.bf16.mxu0 (!%p904_p6), %v1232_v59 }
 0x4b4   :  { %v508_v62 = vld [vmem:[#allocation3] sm:$0x3] (!%p904_p6) }
 0x4b5   :  { %1099 = vmatpush3.bf16.msra.mxu0 (!%p904_p6), %v1098_v60 }
 0x4b8   :  { %1027 = vmatmul.mubr.msk.f32.vlgmr.msra.gmra.mrb[0].mxu0 %vm85_vm1, %v508_v62 }
 0x58b   :  { %v578_v5 = vpop.f32.mrb[0].mxu0 }
 0x58c   :  { %v582_v6 = vadd.f32 %v578_v5, %v507_v63  ;;  %v1028_v7 = vpop.f32.mrb[1].mxu0 }
 0x58e   :  { %1155 = vtanh.f32 %v582_v6 }
 0x598   :  { %v1156_v8 = vpop.eup %1155 }
 0x599   :  { %584 = vst.msk [vmem:[#allocation3] sm:$0x3] %vm169_vm0, %v1156_v8 }
 0x59a PF:  { %p906_p7 = scmp.le.s32.totalorder %s1458_s0, 5 }
 0x59b   :  { %v1101_v9 = vpack.c.bf16 (!%p906_p7), %v1340_v2, %v1338_v1  ;;  %v1235_v10 = vmov (!%p906_p7), 0.0|0.0   ;;  %v1104_v11 = vpack.c.bf16 (!%p906_p7), %v1344_v4, %v1342_v3  ;;  %vm1236_vm7 = vmmov (!%p906_p7), 0   ;;  %v589_v14 = vld [vmem:[#allocation2 + $0xa] sm:$0x3] (!%p906_p7) }
 0x59c   :  { %588 = sbr.rel (%p906_p7) target bundleno = 1670 (0x686), region = 81  ;;  %1100 = vmatprep.subr.bf16.mxu0 (!%p906_p7), %v1235_v10  ;;  %v1237_v12 = vmov (!%p906_p7), 0.0  }
 0x59d   :  { %1102 = vmatpush3.bf16.msra.mxu0 (!%p906_p7), %v1101_v9  ;;  %1037 = vmatprep.mubr.msk.f32.mxu0 (!%p906_p7), %vm1236_vm7, %v1237_v12 }
 0x59e   :  { %1103 = vmatprep.subr.bf16.mxu0 (!%p906_p7), %v1235_v10 }
 0x5a0   :  { %v590_v13 = vld [vmem:[#allocation3] sm:$0x3] (!%p906_p7) }
 0x5a1   :  { %1105 = vmatpush3.bf16.msra.mxu0 (!%p906_p7), %v1104_v11 }
 0x5a4   :  { %1038 = vmatmul.mubr.msk.f32.vlgmr.msra.gmra.mrb[0].mxu0 %vm85_vm1, %v590_v13 }
 0x677   :  { %v660_v15 = vpop.f32.mrb[0].mxu0 }
 0x678   :  { %v664_v16 = vadd.f32 %v660_v15, %v589_v14  ;;  %v1039_v17 = vpop.f32.mrb[1].mxu0 }
 0x67a   :  { %1157 = vtanh.f32 %v664_v16 }
 0x684   :  { %v1158_v18 = vpop.eup %1157 }
 0x685   :  { %666 = vst.msk [vmem:[#allocation3] sm:$0x3] %vm169_vm0, %v1158_v18 }
 0x686 PF:  { %p908_p8 = scmp.le.s32.totalorder %s1458_s0, 6 }
 0x687   :  { %v1107_v19 = vpack.c.bf16 (!%p908_p8), %v1340_v2, %v1338_v1  ;;  %v1238_v20 = vmov (!%p908_p8), 0.0|0.0   ;;  %v1110_v21 = vpack.c.bf16 (!%p908_p8), %v1344_v4, %v1342_v3  ;;  %vm1239_vm8 = vmmov (!%p908_p8), 0   ;;  %v671_v24 = vld [vmem:[#allocation2 + $0xc] sm:$0x3] (!%p908_p8) }
 0x688   :  { %670 = sbr.rel (%p908_p8) target bundleno = 1906 (0x772), region = 85  ;;  %1106 = vmatprep.subr.bf16.mxu0 (!%p908_p8), %v1238_v20  ;;  %v1240_v22 = vmov (!%p908_p8), 0.0  }
 0x689   :  { %1108 = vmatpush3.bf16.msra.mxu0 (!%p908_p8), %v1107_v19  ;;  %1048 = vmatprep.mubr.msk.f32.mxu0 (!%p908_p8), %vm1239_vm8, %v1240_v22 }
 0x68a   :  { %1109 = vmatprep.subr.bf16.mxu0 (!%p908_p8), %v1238_v20 }
 0x68c   :  { %v672_v23 = vld [vmem:[#allocation3] sm:$0x3] (!%p908_p8) }
 0x68d   :  { %1111 = vmatpush3.bf16.msra.mxu0 (!%p908_p8), %v1110_v21 }
 0x690   :  { %1049 = vmatmul.mubr.msk.f32.vlgmr.msra.gmra.mrb[0].mxu0 %vm85_vm1, %v672_v23 }
 0x763   :  { %v742_v25 = vpop.f32.mrb[0].mxu0 }
 0x764   :  { %v746_v26 = vadd.f32 %v742_v25, %v671_v24  ;;  %v1050_v27 = vpop.f32.mrb[1].mxu0 }
 0x766   :  { %1159 = vtanh.f32 %v746_v26 }
 0x770   :  { %v1160_v28 = vpop.eup %1159 }
 0x771   :  { %748 = vst.msk [vmem:[#allocation3] sm:$0x3] %vm169_vm0, %v1160_v28 }
 0x772 PF:  { %p910_p9 = scmp.le.s32.totalorder %s1458_s0, 7 }
 0x773   :  { %v1113_v29 = vpack.c.bf16 (!%p910_p9), %v1340_v2, %v1338_v1  ;;  %v1241_v30 = vmov (!%p910_p9), 0.0|0.0   ;;  %v1116_v31 = vpack.c.bf16 (!%p910_p9), %v1344_v4, %v1342_v3  ;;  %vm1242_vm9 = vmmov (!%p910_p9), 0   ;;  %v753_v34 = vld [vmem:[#allocation2 + $0xe] sm:$0x3] (!%p910_p9) }
 0x774   :  { %752 = sbr.rel (%p910_p9) target bundleno = 2142 (0x85e), region = 89  ;;  %1112 = vmatprep.subr.bf16.mxu0 (!%p910_p9), %v1241_v30  ;;  %v1243_v32 = vmov (!%p910_p9), 0.0  }
 0x775   :  { %1114 = vmatpush3.bf16.msra.mxu0 (!%p910_p9), %v1113_v29  ;;  %1059 = vmatprep.mubr.msk.f32.mxu0 (!%p910_p9), %vm1242_vm9, %v1243_v32 }
 0x776   :  { %1115 = vmatprep.subr.bf16.mxu0 (!%p910_p9), %v1241_v30 }
 0x778   :  { %v754_v33 = vld [vmem:[#allocation3] sm:$0x3] (!%p910_p9) }
 0x779   :  { %1117 = vmatpush3.bf16.msra.mxu0 (!%p910_p9), %v1116_v31 }
 0x77c   :  { %1060 = vmatmul.mubr.msk.f32.vlgmr.msra.gmra.mrb[0].mxu0 %vm85_vm1, %v754_v33 }
 0x84f   :  { %v824_v35 = vpop.f32.mrb[0].mxu0 }
 0x850   :  { %v828_v36 = vadd.f32 %v824_v35, %v753_v34  ;;  %v1061_v37 = vpop.f32.mrb[1].mxu0 }
 0x852   :  { %1161 = vtanh.f32 %v828_v36 }
 0x85c   :  { %v1162_v1 = vpop.eup %1161 }
 0x85d   :  { %830 = vst.msk [vmem:[#allocation3] sm:$0x3] %vm169_vm0, %v1162_v1 }
 0x85e PF:  { %v836_v2 = vld [vmem:[%s1461_s3] sm:$0x3]  ;;  %vm857_vm10 = vcmask 58368   ;;  %v832_v48 = vstv %s1458_s0  ;;  %vm885_vm12 = vcmask 1024  }
 0x85f   :  { %v913_v3 = vld [vmem:[%s1466_s8] ss:$0 sm:$0xff] }
 0x860   :  { %v844_v38 = vmul.f32 %v913_v3, %v836_v2  ;;  %v915_v39 = vld [vmem:[%s1468_s10] ss:$0 sm:$0xff] }
 0x861   :  { %v848_v40 = vld [vmem:[%s1460_s2] sm:$0x3] }
 0x862   :  { %v914_v41 = vld [vmem:[%s1467_s9] ss:$0 sm:$0xff]  ;;  %v845_v44 = vsel %vm169_vm0, %v844_v38, 0.0  ;;  %s876_s9 = sld [smem:[#allocation5]] }
 0x863   :  { %v856_v43 = vmul.f32 %v914_v41, %v848_v40  ;;  %846 = vadd.xlane.f32.xlu0 %v845_v44  ;;  %v831_v47 = vld [vmem:[%s1459_s1] sm:$0x3] }
 0x864   :  { %v862_v4 = vld [vmem:[#allocation3] sm:$0x3]  ;;  %vm833_vm11 = vcmp.eq.s32.totalorder %v831_v47, %v832_v48 }
 0x865   :  { %v870_v42 = vmul.f32 %v915_v39, %v862_v4  ;;  %v858_v46 = vsel %vm857_vm10, %v856_v43, 0.0  ;;  %v912_v50 = vsel %vm833_vm11, 1.0, %v1219_v0 }
 0x867   :  { %v871_v45 = vsel %vm169_vm0, %v870_v42, 0.0  ;;  %859 = vadd.xlane.f32.xlu0 %v858_v46 }
 0x868   :  { %872 = vadd.xlane.f32.xlu1 %v871_v45  ;;  %v877_v55 = vstv %s876_s9 }
 0x8f0   :  { %v847_v49 = vpop.xlane.xlu0 %846 }
 0x8f4   :  { %v860_v53 = vpop.xlane.xlu0 %859 }
 0x8f5   :  { %v873_v51 = vpop.xlane.xlu1 %872  ;;  %v861_v54 = vadd.f32 %v860_v53, %v847_v49 }
 0x8f6   :  { %v874_v52 = vmul.f32 %v912_v50, %v873_v51 }
 0x8f8   :  { %v875_v56 = vadd.f32 %v874_v52, %v861_v54 }
 0x8fa   :  { %v878_v57 = vadd.f32 %v877_v55, %v875_v56 }
 0x8fc   :  { %v916_v58 = vmul.f32 -1.442695, %v878_v57 }
 0x8fe   :  { %1163 = vpow2.f32 %v916_v58 }
 0x908   :  { %v1164_v59 = vpop.eup %1163 }
 0x909   :  { %v882_v60 = vadd.f32 1.0, %v1164_v59 }
 0x90b   :  { %1165 = vrcp.f32 %v882_v60 }
 0x915   :  { %v1166_v61 = vpop.eup %1165 }
 0x916   :  { %886 = vst.msk [vmem:[%s1470_s12] sm:$0x3] %vm885_vm12, %v1166_v61 }
 0x917   :  { %891 = vsyncpa [#allocation7], 1 }
 0x918   :  { %892 = vsyncpa [#allocation9], 1 }

</bundles_post_ra>
